<compile_context>
chip_gen: v5e
topology: v5e:2x2
jax: 0.10.0
libtpu: 0.0.40
codegen_flags: <defaults>
</compile_context>

<pallas_src>
import jax
import jax.numpy as jnp
from jax.experimental import pallas as pl
from jax.experimental.pallas import tpu as pltpu


# --------------------------------------------------------------------------
# Fused path: weight resident in VMEM, x read once, residual added in-vreg.
# --------------------------------------------------------------------------
def _residual_linear_fused_kernel(x_ref, w_ref, b_ref, o_ref):
    # x_ref: (TM, H), w_ref: (H, H), b_ref: (1, H), o_ref: (TM, H)
    x = x_ref[...]
    y = jnp.dot(x, w_ref[...], preferred_element_type=jnp.float32)   # MXU
    y = y + b_ref[...].astype(jnp.float32)                           # bias
    o_ref[...] = (y + x.astype(jnp.float32)).astype(o_ref.dtype)     # residual


# --------------------------------------------------------------------------
# General tiled path: (M, N, K) grid, weight streamed, f32 accumulator.
# --------------------------------------------------------------------------
def _residual_linear_kernel(x_mm_ref, w_ref, b_ref, x_res_ref, o_ref, acc_ref):
    # x_mm_ref:  (TM, TK)   matmul operand tile of x
    # w_ref:     (TK, TN)   weight tile
    # b_ref:     (1,  TN)   bias tile
    # x_res_ref: (TM, TN)   residual tile of x (output-column aligned)
    # o_ref:     (TM, TN)   output tile
    # acc_ref:   (TM, TN)   f32 accumulator scratch (resident across K)
    k = pl.program_id(2)

    @pl.when(k == 0)
    def _():
        # Fold bias into the accumulator init (broadcast over rows).
        acc_ref[...] = jnp.broadcast_to(
            b_ref[...].astype(jnp.float32), acc_ref.shape)

    acc_ref[...] += jnp.dot(
        x_mm_ref[...], w_ref[...], preferred_element_type=jnp.float32)  # MXU

    @pl.when(k == pl.num_programs(2) - 1)
    def _():
        # Residual add in f32, single lane-dense output write.
        o_ref[...] = (acc_ref[...] +
                      x_res_ref[...].astype(jnp.float32)).astype(o_ref.dtype)


def _pick_tile(dim, candidates):
    for t in candidates:
        if dim >= t and dim % t == 0:
            return t
    return dim  # fall back to the full (untiled) dimension


def residual_linear(x, w, b, *, tile_m=None, tile_n=None, tile_k=None):
    """out = (x @ w + b) + x   with x: (B, S, H), w: (H, H), b: (H,)."""
    B, S, H = x.shape
    M = B * S
    x2 = x.reshape(M, H)
    b2 = b.reshape(1, H)

    isz = x.dtype.itemsize
    wsz = w.dtype.itemsize

    # M tiled in 256/512-wide steps when possible (MXU-friendly, amortizes
    # per-step overhead), smaller multiples otherwise; full M as fallback.
    tm = tile_m or _pick_tile(M, (512, 256, 128, 64, 32, 16, 8))

    weight_bytes = H * H * wsz
    use_fused = (tile_n is None and tile_k is None
                 and weight_bytes <= 8 * 1024 * 1024)

    if use_fused:
        # -------- fused: x read once, weight resident across all M tiles ----
        grid = (M // tm,)
        vmem_bytes = (2 * tm * H * isz        # x tiles (double-buffered)
                      + 2 * weight_bytes      # weight (block index constant)
                      + 2 * H * b.dtype.itemsize
                      + 2 * tm * H * isz)     # output tiles
        vmem_limit = int(min(max(int(vmem_bytes * 1.5), 32 * 1024 * 1024),
                             56 * 1024 * 1024))
        cost = pl.CostEstimate(
            flops=2 * M * H * H,
            transcendentals=0,
            bytes_accessed=(M * H * isz + weight_bytes
                            + H * b.dtype.itemsize + M * H * isz))

        out2 = pl.pallas_call(
            _residual_linear_fused_kernel,
            out_shape=jax.ShapeDtypeStruct((M, H), x.dtype),
            grid_spec=pltpu.PrefetchScalarGridSpec(
                num_scalar_prefetch=0,
                grid=grid,
                in_specs=[
                    pl.BlockSpec((tm, H), lambda i: (i, 0)),   # x
                    pl.BlockSpec((H, H), lambda i: (0, 0)),    # w (resident)
                    pl.BlockSpec((1, H), lambda i: (0, 0)),    # bias
                ],
                out_specs=pl.BlockSpec((tm, H), lambda i: (i, 0)),
            ),
            compiler_params=pltpu.CompilerParams(
                dimension_semantics=("parallel",),
                vmem_limit_bytes=vmem_limit,
            ),
            cost_estimate=cost,
        )(x2, w, b2)
        return out2.reshape(B, S, H)

    # -------- general tiled path: weight streamed over N/K tiles ------------
    tn = tile_n or _pick_tile(H, (256, 128))
    tk = tile_k or _pick_tile(H, (512, 256, 128))
    grid = (M // tm, H // tn, H // tk)

    vmem_bytes = (2 * tm * tk * isz                  # x matmul tiles
                  + 2 * tk * tn * wsz                # weight tiles
                  + 2 * 1 * tn * b.dtype.itemsize    # bias
                  + 2 * tm * tn * isz                # x residual tiles
                  + 2 * tm * tn * isz                # output tiles
                  + tm * tn * 4)                     # accumulator scratch
    vmem_limit = int(min(max(int(vmem_bytes * 1.5), 32 * 1024 * 1024),
                         56 * 1024 * 1024))

    cost = pl.CostEstimate(
        flops=2 * M * H * H,
        transcendentals=0,
        bytes_accessed=(2 * M * H * isz + weight_bytes
                        + H * b.dtype.itemsize + M * H * isz))

    out2 = pl.pallas_call(
        _residual_linear_kernel,
        out_shape=jax.ShapeDtypeStruct((M, H), x.dtype),
        grid_spec=pltpu.PrefetchScalarGridSpec(
            num_scalar_prefetch=0,
            grid=grid,
            in_specs=[
                pl.BlockSpec((tm, tk), lambda i, j, k: (i, k)),  # x (matmul)
                pl.BlockSpec((tk, tn), lambda i, j, k: (k, j)),  # w
                pl.BlockSpec((1, tn), lambda i, j, k: (0, j)),   # bias
                pl.BlockSpec((tm, tn), lambda i, j, k: (i, j)),  # x (residual)
            ],
            out_specs=pl.BlockSpec((tm, tn), lambda i, j, k: (i, j)),
            scratch_shapes=[pltpu.VMEM((tm, tn), jnp.float32)],
        ),
        compiler_params=pltpu.CompilerParams(
            dimension_semantics=("parallel", "parallel", "arbitrary"),
            vmem_limit_bytes=vmem_limit,
        ),
        cost_estimate=cost,
    )(x2, w, b2, x2)

    return out2.reshape(B, S, H)


if __name__ == "__main__":
    key = jax.random.PRNGKey(0)

    def run_case(B, S, H, atol, rtol, **tile_kwargs):
        kx, kw, kb = jax.random.split(jax.random.fold_in(key, B * S * H), 3)
        x = jax.random.normal(kx, (B, S, H), dtype=jnp.float32)
        # deterministic synthetic parameters for the wrapped fn (Linear H->H)
        w = jax.random.normal(kw, (H, H), dtype=jnp.float32) * (1.0 / jnp.sqrt(H))
        b = jax.random.normal(kb, (H,), dtype=jnp.float32) * 0.01

        out = residual_linear(x, w, b, **tile_kwargs)
        jax.block_until_ready(out)

        # correctness check against plain-JAX reference: fn(x) + x
        ref = jnp.einsum("bsh,hk->bsk", x, w) + b + x
        assert out.shape == x.shape and out.dtype == x.dtype
        assert jnp.allclose(out, ref, atol=atol, rtol=rtol), (
            f"mismatch at B={B} S={S} H={H}: "
            f"max err {jnp.max(jnp.abs(out - ref))}")

    # Tiny hidden size (fused path, sub-128 lane dim equals full array dim).
    run_case(2, 8, 32, atol=1e-4, rtol=1e-4)
    # Small shape consistent with the module spec (fused single-block path).
    run_case(2, 8, 128, atol=1e-4, rtol=1e-4)
    # Larger shape — fused path with weight resident, M tiled.
    run_case(2, 512, 512, atol=5e-3, rtol=5e-3)
    # Same shape forced through the general M/N/K-tiled path (exercises the
    # accumulator init / residual-finalize code).
    run_case(2, 512, 512, atol=5e-3, rtol=5e-3, tile_n=256, tile_k=256)

    print("KERNEL_OK")
</pallas_src>

<mosaic_0001>
module attributes {stable_mosaic.version = 11 : i64} {
  func.func @_residual_linear_fused_kernel(%arg0: i32, %arg1: memref<16x32xf32, #tpu.memory_space<vmem>>, %arg2: memref<32x32xf32, #tpu.memory_space<vmem>>, %arg3: memref<1x32xf32, #tpu.memory_space<vmem>>, %arg4: memref<16x32xf32, #tpu.memory_space<vmem>>) attributes {dimension_semantics = [#tpu.dimension_semantics<parallel>], iteration_bounds = array<i64: 1>, scalar_prefetch = 0 : i64, scratch_operands = 0 : i64, tpu.core_type = #tpu.core_type<tc>, window_params = [{transform_indices = @transform_0, window_bounds = array<i64: 16, 32>}, {pipeline_mode = #tpu.pipeline_mode<synchronous>, transform_indices = @transform_1, window_bounds = array<i64: 32, 32>}, {pipeline_mode = #tpu.pipeline_mode<synchronous>, transform_indices = @transform_2, window_bounds = array<i64: 1, 32>}, {transform_indices = @transform_3, window_bounds = array<i64: 16, 32>}]} {
    %c0 = arith.constant 0 : index
    %c0_0 = arith.constant 0 : index
    %0 = vector.load %arg1[%c0, %c0_0] : memref<16x32xf32, #tpu.memory_space<vmem>>, vector<16x32xf32>
    %c0_1 = arith.constant 0 : index
    %c0_2 = arith.constant 0 : index
    %1 = vector.load %arg2[%c0_1, %c0_2] : memref<32x32xf32, #tpu.memory_space<vmem>>, vector<32x32xf32>
    %cst = arith.constant dense<0.000000e+00> : vector<16x32xf32>
    %2 = tpu.matmul %0, %1, %cst {dimension_numbers = #tpu.dot_dimension_numbers<[1], [0], [0], [1], [0, 0, 1, 1], [], []>} : vector<16x32xf32>, vector<32x32xf32>, vector<16x32xf32> -> vector<16x32xf32>
    %c0_3 = arith.constant 0 : index
    %c0_4 = arith.constant 0 : index
    %3 = vector.load %arg3[%c0_3, %c0_4] : memref<1x32xf32, #tpu.memory_space<vmem>>, vector<1x32xf32>
    %4 = vector.broadcast %3 : vector<1x32xf32> to vector<16x32xf32>
    %5 = arith.addf %2, %4 : vector<16x32xf32>
    %6 = arith.addf %5, %0 : vector<16x32xf32>
    %c0_5 = arith.constant 0 : index
    %c0_6 = arith.constant 0 : index
    %7 = vector.load %arg4[%c0_5, %c0_6] : memref<16x32xf32, #tpu.memory_space<vmem>>, vector<16x32xf32>
    tpu.vector_store %arg4[%c0_5, %c0_6], %6 {strides = array<i32>} : memref<16x32xf32, #tpu.memory_space<vmem>>, vector<16x32xf32>,
    return
  }
  func.func @transform_0(%arg0: i32) -> (i32, i32) {
    %c0_i32 = arith.constant 0 : i32
    %c0_i32_0 = arith.constant 0 : i32
    return %arg0, %c0_i32 : i32, i32
  }
  func.func @transform_1(%arg0: i32) -> (i32, i32) {
    %c0_i32 = arith.constant 0 : i32
    %c0_i32_0 = arith.constant 0 : i32
    %c0_i32_1 = arith.constant 0 : i32
    return %c0_i32, %c0_i32_0 : i32, i32
  }
  func.func @transform_2(%arg0: i32) -> (i32, i32) {
    %c0_i32 = arith.constant 0 : i32
    %c0_i32_0 = arith.constant 0 : i32
    %c0_i32_1 = arith.constant 0 : i32
    return %c0_i32, %c0_i32_0 : i32, i32
  }
  func.func @transform_3(%arg0: i32) -> (i32, i32) {
    %c0_i32 = arith.constant 0 : i32
    %c0_i32_0 = arith.constant 0 : i32
    return %arg0, %c0_i32 : i32, i32
  }
}

</mosaic_0001>

<bundles_post_ra>
// kernel: tpu_custom_call.1
= control target key start
LH: loop header
LB: loop body
LE: loop exit
PB: predicated region body
PF: predicated region fallthrough
CT: control target
= control target key end

     0   :  { %8 = vsyncpa [#allocation3], 0  ;;  %s251_s0 = inlined_call_operand.hbm [shape: f32[16,32], index: 0, kind: input, shape index: {}]   ;;  %s252_s1 = inlined_call_operand.hbm [shape: f32[32,32], index: 1, kind: input, shape index: {}]   ;;  %s253_s2 = inlined_call_operand.vmem [shape: f32[1,32], index: 2, kind: input, shape index: {}]   ;;  %s254_s3 = inlined_call_operand.hbm [shape: f32[16,32], index: 3, kind: output, shape index: {}]  }
   0x1   :  { %9 = vsyncpa [#allocation6], 0 }
   0x2   :  { %10 = vsyncpa [#allocation4], 0  ;;  %s15_s14 = sshll.u32 %s251_s0, 4  ;;  %s201_s15 = smov [#allocation2]   ;;  %s16_s14 = int_to_ptr.hbm [resolvable:$true] %s15_s14 }
   0x3   :  { %s17_s16 = sshll.u32 %s201_s15, 4  ;;  %s28_s19 = sshll.u32 %s252_s1, 4  ;;  %s18_s16 = int_to_ptr.vmem [resolvable:$true] %s17_s16  ;;  %s29_s19 = int_to_ptr.hbm [resolvable:$true] %s28_s19 }
   0x4   :  { %s202_s20 = smov 128   ;;  %s203_s21 = smov 8  }
   0x5   :  { %23 = dma.hbm_to_vmem [thread:$0]  %s16_s14, 256, %s18_s16, [#allocation3], %s202_s20, %s202_s20, %s203_s21  }
   0x6   :  { %s204_s22 = smov [#allocation5]  }
   0x7   :  { %s30_s23 = sshll.u32 %s204_s22, 4  ;;  %s31_s23 = int_to_ptr.vmem [resolvable:$true] %s30_s23 }
   0x8   :  { %36 = dma.hbm_to_vmem [thread:$0]  %s29_s19, 512, %s31_s23, [#allocation6], %s202_s20, %s202_s20, %s203_s21  }
   0x9   :  { %195 = dma.done.wait [#allocation3], 256  }
   0xa   :  { %196 = vsyncadd [#allocation3], 4294967040 }
   0xb   :  { %197 = dma.done.wait [#allocation6], 512  }
   0xc   :  { %198 = vsyncadd [#allocation6], 4294966784  ;;  %v52_v0 = vld [vmem:[#allocation5 + $0x18] sm:$0xff]  ;;  %v51_v1 = vld [vmem:[#allocation5 + $0x10] sm:$0xff]  ;;  %vm57_vm0 = vcmask 261120   ;;  %s205_s24 = smov [#allocation7]  }
   0xd   :  { %76 = vmatpush.msra.mxu0 %v52_v0  ;;  %113 = vmatpush.msra.mxu1 %v52_v0  ;;  %v50_v2 = vld [vmem:[#allocation5 + $0x8] sm:$0xff]  ;;  %v49_v3 = vld [vmem:[#allocation5] sm:$0xff]  ;;  %v47_v4 = vld [vmem:[#allocation2] sm:$0xff]  ;;  %s95_s25 = sshll.u32 %s205_s24, 4  ;;  %s97_s28 = sshll.u32 %s254_s3, 4  ;;  %s96_s25 = int_to_ptr.vmem [resolvable:$true] %s95_s25  ;;  %s98_s28 = int_to_ptr.hbm [resolvable:$true] %s97_s28 }
   0xe   :  { %v48_v5 = vld [vmem:[#allocation2 + $0x8] sm:$0xff]  ;;  %v122_v6 = vld [vmem:[%s253_s2] ss:$0 sm:$0xff] }
   0xf   :  { %77 = vmatpush.msra.mxu0 %v51_v1  ;;  %114 = vmatpush.msra.mxu1 %v51_v1 }
  0x11   :  { %78 = vmatpush.msra.mxu0 %v50_v2  ;;  %115 = vmatpush.msra.mxu1 %v50_v2 }
  0x13   :  { %79 = vmatpush.msra.mxu0 %v49_v3  ;;  %116 = vmatpush.msra.mxu1 %v49_v3 }
  0x14   :  { %111 = vmatmul.msk.f32.vlgmr.msra.gmra.mxu0 %vm57_vm0, %v47_v4  ;;  %112 = vmatmul.msk.f32.vlgmr.msra.gmra.mxu1 %vm57_vm0, %v48_v5 }
  0x91   :  { %v81_v7 = vpop.f32.mrf.mxu0  ;;  %v84_v8 = vpop.f32.mrf.mxu1 }
  0x92   :  { %v82_v9 = vadd.f32 %v122_v6, %v81_v7  ;;  %v85_v10 = vadd.f32 %v122_v6, %v84_v8 }
  0x94   :  { %v87_v11 = vadd.f32 %v82_v9, %v47_v4  ;;  %v88_v12 = vadd.f32 %v85_v10, %v48_v5 }
  0x96   :  { %89 = vst.msk [vmem:[#allocation7] sm:$0xff] %vm57_vm0, %v87_v11 }
  0x97   :  { %90 = vst.msk [vmem:[#allocation7 + $0x8] sm:$0xff] %vm57_vm0, %v88_v12 }
  0x98   :  { %103 = dma.vmem_to_hbm [thread:$0]  %s96_s25, 256, %s98_s28, [#allocation4], %s202_s20, %s202_s20, %s203_s21  }
  0x99   :  { %199 = dma.done.wait [#allocation4], 256  }
  0x9a   :  { %200 = vsyncadd [#allocation4], 4294967040 }
  0x9b   :  { %108 = vsyncpa [#allocation3], 1 }
  0x9c   :  { %109 = vsyncpa [#allocation6], 1 }
  0x9d   :  { %110 = vsyncpa [#allocation4], 1 }

</bundles_post_ra>
